<compile_context>
chip_gen: v6e
topology: v6e:2x2x1
jax: 0.10.0
libtpu: 0.0.40
codegen_flags: <defaults>
</compile_context>

<pallas_src>
import functools

import numpy as np
import jax
import jax.numpy as jnp
from jax import lax
from jax.experimental import pallas as pl
from jax.experimental.pallas import tpu as pltpu


_NEG = -1.0e30  # large negative instead of -inf: keeps the online-lse updates NaN-free


def _round_up(x, m):
    return ((x + m - 1) // m) * m


# ------------------------------------------------------------------
# Pallas kernel
# ------------------------------------------------------------------
def _contrastive_kernel(text_ref, img_ref, out_ref,
                        m_row, l_row, m_col, l_col, s_row, s_diag,
                        *, inv_temp, tile, batch, padded):
    # text_ref : (tile, D)   current block of text embeddings (rows of logits)
    # img_ref  : (tile, D)   current block of image embeddings (cols of logits)
    # out_ref  : (1, 1)      final scalar loss (written on the last step only)
    # m_row/l_row : (tile, 1)        online row-lse state (reset per row block)
    # m_col/l_col : (nblk, 1, tile)  online col-lse state (persists across row blocks)
    # s_row/s_diag: (1, 1)           accumulated sum of row-lse / diagonal logits
    i = pl.program_id(0)          # row block index (text)
    j = pl.program_id(1)          # column block index (image)
    nr = pl.num_programs(0)
    nc = pl.num_programs(1)

    @pl.when(jnp.logical_and(i == 0, j == 0))
    def _init_scalars():
        s_row[...] = jnp.zeros_like(s_row)
        s_diag[...] = jnp.zeros_like(s_diag)

    @pl.when(j == 0)
    def _init_row_state():
        m_row[...] = jnp.full_like(m_row, _NEG)
        l_row[...] = jnp.zeros_like(l_row)

    @pl.when(i == 0)
    def _init_col_state():
        m_col[j] = jnp.full((1, tile), _NEG, jnp.float32)
        l_col[j] = jnp.zeros((1, tile), jnp.float32)

    # Fold 1/T into the (tile, D) text block (cheaper than scaling (tile, tile) logits
    # when D < B). Operands stay in their native (possibly bf16) dtype -> fast MXU path;
    # accumulation is f32.
    t_blk = text_ref[...]
    t_blk = t_blk * jnp.asarray(inv_temp, dtype=t_blk.dtype)
    logits = lax.dot_general(
        t_blk, img_ref[...],
        dimension_numbers=(((1,), (1,)), ((), ())),
        preferred_element_type=jnp.float32,
    )                                                             # (tile, tile) f32

    if padded:
        row_iota = lax.broadcasted_iota(jnp.int32, (tile, 1), 0)
        col_iota = lax.broadcasted_iota(jnp.int32, (1, tile), 1)
        row_valid = (i * tile + row_iota) < batch                 # (tile, 1)
        col_valid = (j * tile + col_iota) < batch                 # (1, tile)
        logits_r = jnp.where(col_valid, logits, _NEG)             # mask padded image cols
        logits_c = jnp.where(row_valid, logits, _NEG)             # mask padded text rows
    else:
        logits_r = logits
        logits_c = logits

    # ---- row direction (image->text CE): online logsumexp across column blocks ----
    m_blk = jnp.max(logits_r, axis=1, keepdims=True)              # (tile, 1)
    m_new = jnp.maximum(m_row[...], m_blk)
    l_row[...] = (l_row[...] * jnp.exp(m_row[...] - m_new)
                  + jnp.sum(jnp.exp(logits_r - m_new), axis=1, keepdims=True))
    m_row[...] = m_new

    @pl.when(j == nc - 1)
    def _flush_row_lse():
        lse = m_row[...] + jnp.log(l_row[...])                    # (tile, 1)
        if padded:
            lse = jnp.where(row_valid, lse, 0.0)
        s_row[...] += jnp.sum(lse).reshape(1, 1)

    # ---- column direction (text->image CE): online logsumexp across row blocks ----
    mc = m_col[j]                                                 # (1, tile)
    lc = l_col[j]
    m_blk_c = jnp.max(logits_c, axis=0, keepdims=True)            # (1, tile)
    m_new_c = jnp.maximum(mc, m_blk_c)
    l_col[j] = (lc * jnp.exp(mc - m_new_c)
                + jnp.sum(jnp.exp(logits_c - m_new_c), axis=0, keepdims=True))
    m_col[j] = m_new_c

    # ---- diagonal logits (ground truth = arange): only i == j blocks contain it ----
    @pl.when(i == j)
    def _diag():
        r = lax.broadcasted_iota(jnp.int32, (tile, tile), 0)
        c = lax.broadcasted_iota(jnp.int32, (tile, tile), 1)
        mask = r == c
        if padded:
            mask = jnp.logical_and(mask, (i * tile + r) < batch)
        s_diag[...] += jnp.sum(jnp.where(mask, logits, 0.0)).reshape(1, 1)

    # ---- finalize: merge both directions into the scalar loss ----
    @pl.when(jnp.logical_and(i == nr - 1, j == nc - 1))
    def _finalize():
        lse_c = m_col[...] + jnp.log(jnp.maximum(l_col[...], 1e-37))  # (nblk, 1, tile)
        if padded:
            ids = (lax.broadcasted_iota(jnp.int32, l_col.shape, 0) * tile
                   + lax.broadcasted_iota(jnp.int32, l_col.shape, 2))
            lse_c = jnp.where(ids < batch, lse_c, 0.0)
        s_col = jnp.sum(lse_c).reshape(1, 1)
        inv_b = 1.0 / batch
        # loss = (mean(lse_row) + mean(lse_col)) / 2 - mean(diag)
        out_ref[...] = (s_row[...] + s_col) * (0.5 * inv_b) - s_diag[...] * inv_b


# ------------------------------------------------------------------
# Wrapper
# ------------------------------------------------------------------
def contrastive_loss_pallas(text_embeddings, image_embeddings, temperature=0.07):
    text = jnp.asarray(text_embeddings)     # native dtype (bf16 stays bf16)
    image = jnp.asarray(image_embeddings)
    B, D = text.shape
    assert image.shape == (B, D), "text/image embeddings must share shape (B, D)"

    # Square row/column tile: big enough to amortize per-step pipeline overhead,
    # small enough that the (tile, tile) f32 logits block plus two (tile, D) input
    # blocks fit comfortably on every chip generation (incl. v7x's 64 MiB VMEM).
    if B <= 512:
        tile = _round_up(B, 8)
    else:
        tile = 256
    Bp = _round_up(B, tile)
    padded = Bp != B
    if padded:
        pad = Bp - B
        text = jnp.pad(text, ((0, pad), (0, 0)))
        image = jnp.pad(image, ((0, pad), (0, 0)))
    nblk = Bp // tile
    grid = (nblk, nblk)

    itemsize = text.dtype.itemsize
    # VMEM estimate: double-buffered input blocks + f32 logits/exp temporaries + state.
    vmem_est = (4 * tile * D * itemsize                 # text + image blocks, x2 buffers
                + 8 * tile * tile * 4                   # logits + exp temporaries headroom
                + 2 * tile * 128 * 4                    # row-lse state (lane padded)
                + 2 * nblk * 8 * max(tile, 128) * 4     # col-lse state (sublane padded)
                + 4096)
    vmem_limit = int(min(64 * 2**20, max(2 * vmem_est, 16 * 2**20)))

    kernel = functools.partial(
        _contrastive_kernel,
        inv_temp=float(1.0 / temperature),
        tile=tile,
        batch=int(B),
        padded=padded,
    )

    out = pl.pallas_call(
        kernel,
        out_shape=jax.ShapeDtypeStruct((1, 1), jnp.float32),
        grid_spec=pltpu.PrefetchScalarGridSpec(
            num_scalar_prefetch=0,
            grid=grid,
            in_specs=[
                pl.BlockSpec((tile, D), lambda i, j: (i, 0)),   # text rows (resident over j)
                pl.BlockSpec((tile, D), lambda i, j: (j, 0)),   # image cols (streamed over j)
            ],
            out_specs=pl.BlockSpec((1, 1), lambda i, j: (0, 0)),
            scratch_shapes=[
                pltpu.VMEM((tile, 1), jnp.float32),        # m_row
                pltpu.VMEM((tile, 1), jnp.float32),        # l_row
                pltpu.VMEM((nblk, 1, tile), jnp.float32),  # m_col
                pltpu.VMEM((nblk, 1, tile), jnp.float32),  # l_col
                pltpu.VMEM((1, 1), jnp.float32),           # s_row
                pltpu.VMEM((1, 1), jnp.float32),           # s_diag
            ],
        ),
        compiler_params=pltpu.CompilerParams(
            # both axes carry online-logsumexp state across iterations -> sequential
            dimension_semantics=("arbitrary", "arbitrary"),
            vmem_limit_bytes=vmem_limit,
        ),
        cost_estimate=pl.CostEstimate(
            flops=2 * B * B * D,
            transcendentals=2 * B * B,
            bytes_accessed=2 * B * D * itemsize + 4,
        ),
    )(text, image)
    return out[0, 0]


# ------------------------------------------------------------------
# Module-like wrapper mirroring the PyTorch ContrastiveLoss
# ------------------------------------------------------------------
class ContrastiveLossPallas:
    def __init__(self):
        self.temperature = 0.07

    def forward(self, text_embeddings, image_embeddings):
        return contrastive_loss_pallas(text_embeddings, image_embeddings,
                                       self.temperature)

    __call__ = forward


# ------------------------------------------------------------------
# Reference (pure JAX, same math as the PyTorch module)
# ------------------------------------------------------------------
def _reference_loss(text, image, temperature=0.07):
    logits = (text.astype(jnp.float32) @ image.astype(jnp.float32).T) / temperature
    lse_row = jax.nn.logsumexp(logits, axis=1)
    lse_col = jax.nn.logsumexp(logits, axis=0)
    diag = jnp.diagonal(logits)
    img_loss = jnp.mean(lse_row - diag)
    text_loss = jnp.mean(lse_col - diag)
    return (img_loss + text_loss) / 2.0


# ------------------------------------------------------------------
# Test
# ------------------------------------------------------------------
if __name__ == "__main__":
    key = jax.random.PRNGKey(0)
    k1, k2, k3, k4 = jax.random.split(key, 4)

    loss_fn = ContrastiveLossPallas()

    # Case 1: aligned batch (B=8, D=32), f32.
    B, D = 8, 32
    text = jax.random.normal(k1, (B, D), jnp.float32)
    image = jax.random.normal(k2, (B, D), jnp.float32)
    loss = jax.block_until_ready(loss_fn(text, image))
    ref = _reference_loss(text, image)
    np.testing.assert_allclose(np.asarray(loss), np.asarray(ref),
                               rtol=1e-4, atol=1e-3)

    # Case 2: unaligned batch (B=5) exercises the pad-and-mask path.
    B2, D2 = 5, 32
    text2 = jax.random.normal(k3, (B2, D2), jnp.float32)
    image2 = jax.random.normal(k4, (B2, D2), jnp.float32)
    loss2 = jax.block_until_ready(loss_fn(text2, image2))
    ref2 = _reference_loss(text2, image2)
    np.testing.assert_allclose(np.asarray(loss2), np.asarray(ref2),
                               rtol=1e-4, atol=1e-3)

    print("KERNEL_OK")
</pallas_src>

<mosaic_0001>
module attributes {stable_mosaic.version = 11 : i64} {
  func.func @_contrastive_kernel(%arg0: i32, %arg1: i32, %arg2: memref<8x32xf32, #tpu.memory_space<vmem>>, %arg3: memref<8x32xf32, #tpu.memory_space<vmem>>, %arg4: memref<1x1xf32, #tpu.memory_space<vmem>>, %arg5: memref<8x1xf32, #tpu.memory_space<vmem>>, %arg6: memref<8x1xf32, #tpu.memory_space<vmem>>, %arg7: memref<1x1x8xf32, #tpu.memory_space<vmem>>, %arg8: memref<1x1x8xf32, #tpu.memory_space<vmem>>, %arg9: memref<1x1xf32, #tpu.memory_space<vmem>>, %arg10: memref<1x1xf32, #tpu.memory_space<vmem>>) attributes {dimension_semantics = [#tpu.dimension_semantics<arbitrary>, #tpu.dimension_semantics<arbitrary>], iteration_bounds = array<i64: 1, 1>, scalar_prefetch = 0 : i64, scratch_operands = 6 : i64, tpu.core_type = #tpu.core_type<tc>, window_params = [{transform_indices = @transform_0, window_bounds = array<i64: 8, 32>}, {transform_indices = @transform_1, window_bounds = array<i64: 8, 32>}, {pipeline_mode = #tpu.pipeline_mode<synchronous>, transform_indices = @transform_2, window_bounds = array<i64: 1, 1>}]} {
    %c0_i32 = arith.constant 0 : i32
    %0 = arith.cmpi eq, %arg0, %c0_i32 : i32
    %c0_i32_0 = arith.constant 0 : i32
    %1 = arith.cmpi eq, %arg1, %c0_i32_0 : i32
    %2 = arith.andi %0, %1 : i1
    %3 = arith.extui %2 : i1 to i32
    %c0_i32_1 = arith.constant 0 : i32
    %4 = arith.cmpi ne, %3, %c0_i32_1 : i32
    scf.if %4 {
      %cst_38 = arith.constant 0.000000e+00 : f32
      %70 = vector.broadcast %cst_38 : f32 to vector<1x1xf32>
      %c0_39 = arith.constant 0 : index
      %c0_40 = arith.constant 0 : index
      %71 = vector.load %arg9[%c0_39, %c0_40] : memref<1x1xf32, #tpu.memory_space<vmem>>, vector<1x1xf32>
      tpu.vector_store %arg9[%c0_39, %c0_40], %70 {strides = array<i32>} : memref<1x1xf32, #tpu.memory_space<vmem>>, vector<1x1xf32>,
      %cst_41 = arith.constant 0.000000e+00 : f32
      %72 = vector.broadcast %cst_41 : f32 to vector<1x1xf32>
      %c0_42 = arith.constant 0 : index
      %c0_43 = arith.constant 0 : index
      %73 = vector.load %arg10[%c0_42, %c0_43] : memref<1x1xf32, #tpu.memory_space<vmem>>, vector<1x1xf32>
      tpu.vector_store %arg10[%c0_42, %c0_43], %72 {strides = array<i32>} : memref<1x1xf32, #tpu.memory_space<vmem>>, vector<1x1xf32>,
    } else {
    }
    %c0_i32_2 = arith.constant 0 : i32
    %5 = arith.cmpi eq, %arg1, %c0_i32_2 : i32
    %6 = arith.extui %5 : i1 to i32
    %c0_i32_3 = arith.constant 0 : i32
    %7 = arith.cmpi ne, %6, %c0_i32_3 : i32
    scf.if %7 {
      %cst_38 = arith.constant -1.000000e+30 : f32
      %70 = vector.broadcast %cst_38 : f32 to vector<8x1xf32>
      %c0_39 = arith.constant 0 : index
      %c0_40 = arith.constant 0 : index
      %71 = vector.load %arg5[%c0_39, %c0_40] : memref<8x1xf32, #tpu.memory_space<vmem>>, vector<8x1xf32>
      tpu.vector_store %arg5[%c0_39, %c0_40], %70 {strides = array<i32>} : memref<8x1xf32, #tpu.memory_space<vmem>>, vector<8x1xf32>,
      %cst_41 = arith.constant 0.000000e+00 : f32
      %72 = vector.broadcast %cst_41 : f32 to vector<8x1xf32>
      %c0_42 = arith.constant 0 : index
      %c0_43 = arith.constant 0 : index
      %73 = vector.load %arg6[%c0_42, %c0_43] : memref<8x1xf32, #tpu.memory_space<vmem>>, vector<8x1xf32>
      tpu.vector_store %arg6[%c0_42, %c0_43], %72 {strides = array<i32>} : memref<8x1xf32, #tpu.memory_space<vmem>>, vector<8x1xf32>,
    } else {
    }
    %c0_i32_4 = arith.constant 0 : i32
    %8 = arith.cmpi eq, %arg0, %c0_i32_4 : i32
    %9 = arith.extui %8 : i1 to i32
    %c0_i32_5 = arith.constant 0 : i32
    %10 = arith.cmpi ne, %9, %c0_i32_5 : i32
    scf.if %10 {
      %cst_38 = arith.constant -1.000000e+30 : f32
      %70 = vector.broadcast %cst_38 : f32 to vector<1x8xf32>
      %71 = arith.index_cast %arg1 : i32 to index
      %c0_39 = arith.constant 0 : index
      %c0_40 = arith.constant 0 : index
      %72 = vector.load %arg7[%71, %c0_39, %c0_40] : memref<1x1x8xf32, #tpu.memory_space<vmem>>, vector<1x1x8xf32>
      %73 = vector.shape_cast %72 : vector<1x1x8xf32> to vector<1x8xf32>
      %74 = vector.shape_cast %70 : vector<1x8xf32> to vector<1x1x8xf32>
      tpu.vector_store %arg7[%71, %c0_39, %c0_40], %74 {strides = array<i32>} : memref<1x1x8xf32, #tpu.memory_space<vmem>>, vector<1x1x8xf32>,
      %cst_41 = arith.constant 0.000000e+00 : f32
      %75 = vector.broadcast %cst_41 : f32 to vector<1x8xf32>
      %76 = arith.index_cast %arg1 : i32 to index
      %c0_42 = arith.constant 0 : index
      %c0_43 = arith.constant 0 : index
      %77 = vector.load %arg8[%76, %c0_42, %c0_43] : memref<1x1x8xf32, #tpu.memory_space<vmem>>, vector<1x1x8xf32>
      %78 = vector.shape_cast %77 : vector<1x1x8xf32> to vector<1x8xf32>
      %79 = vector.shape_cast %75 : vector<1x8xf32> to vector<1x1x8xf32>
      tpu.vector_store %arg8[%76, %c0_42, %c0_43], %79 {strides = array<i32>} : memref<1x1x8xf32, #tpu.memory_space<vmem>>, vector<1x1x8xf32>,
    } else {
    }
    %c0 = arith.constant 0 : index
    %c0_6 = arith.constant 0 : index
    %11 = vector.load %arg2[%c0, %c0_6] : memref<8x32xf32, #tpu.memory_space<vmem>>, vector<8x32xf32>
    %cst = arith.constant 14.2857141 : f32
    %12 = vector.broadcast %cst : f32 to vector<8x32xf32>
    %13 = arith.mulf %11, %12 : vector<8x32xf32>
    %c0_7 = arith.constant 0 : index
    %c0_8 = arith.constant 0 : index
    %14 = vector.load %arg3[%c0_7, %c0_8] : memref<8x32xf32, #tpu.memory_space<vmem>>, vector<8x32xf32>
    %cst_9 = arith.constant dense<0.000000e+00> : vector<8x8xf32>
    %15 = tpu.matmul %13, %14, %cst_9 {dimension_numbers = #tpu.dot_dimension_numbers<[1], [1], [0], [0], [0, 0, 1, 0], [], []>} : vector<8x32xf32>, vector<8x32xf32>, vector<8x8xf32> -> vector<8x8xf32>
    %cst_10 = arith.constant dense<0xFF800000> : vector<8xf32>
    %16 = vector.multi_reduction <maximumf>, %15, %cst_10 [1] : vector<8x8xf32> to vector<8xf32>
    %17 = vector.shape_cast %16 : vector<8xf32> to vector<8x1xf32>
    %c0_11 = arith.constant 0 : index
    %c0_12 = arith.constant 0 : index
    %18 = vector.load %arg5[%c0_11, %c0_12] : memref<8x1xf32, #tpu.memory_space<vmem>>, vector<8x1xf32>
    %19 = arith.maximumf %18, %17 : vector<8x1xf32>
    %c0_13 = arith.constant 0 : index
    %c0_14 = arith.constant 0 : index
    %20 = vector.load %arg6[%c0_13, %c0_14] : memref<8x1xf32, #tpu.memory_space<vmem>>, vector<8x1xf32>
    %c0_15 = arith.constant 0 : index
    %c0_16 = arith.constant 0 : index
    %21 = vector.load %arg5[%c0_15, %c0_16] : memref<8x1xf32, #tpu.memory_space<vmem>>, vector<8x1xf32>
    %22 = arith.subf %21, %19 : vector<8x1xf32>
    %23 = math.exp %22 : vector<8x1xf32>
    %24 = arith.mulf %20, %23 : vector<8x1xf32>
    %25 = vector.broadcast %19 : vector<8x1xf32> to vector<8x8xf32>
    %26 = arith.subf %15, %25 : vector<8x8xf32>
    %27 = math.exp %26 : vector<8x8xf32>
    %cst_17 = arith.constant dense<0.000000e+00> : vector<8xf32>
    %28 = vector.multi_reduction <add>, %27, %cst_17 [1] : vector<8x8xf32> to vector<8xf32>
    %29 = vector.shape_cast %28 : vector<8xf32> to vector<8x1xf32>
    %30 = arith.addf %24, %29 : vector<8x1xf32>
    %c0_18 = arith.constant 0 : index
    %c0_19 = arith.constant 0 : index
    %31 = vector.load %arg6[%c0_18, %c0_19] : memref<8x1xf32, #tpu.memory_space<vmem>>, vector<8x1xf32>
    tpu.vector_store %arg6[%c0_18, %c0_19], %30 {strides = array<i32>} : memref<8x1xf32, #tpu.memory_space<vmem>>, vector<8x1xf32>,
    %c0_20 = arith.constant 0 : index
    %c0_21 = arith.constant 0 : index
    %32 = vector.load %arg5[%c0_20, %c0_21] : memref<8x1xf32, #tpu.memory_space<vmem>>, vector<8x1xf32>
    tpu.vector_store %arg5[%c0_20, %c0_21], %19 {strides = array<i32>} : memref<8x1xf32, #tpu.memory_space<vmem>>, vector<8x1xf32>,
    %c0_i32_22 = arith.constant 0 : i32
    %33 = arith.cmpi eq, %arg1, %c0_i32_22 : i32
    %34 = arith.extui %33 : i1 to i32
    %c0_i32_23 = arith.constant 0 : i32
    %35 = arith.cmpi ne, %34, %c0_i32_23 : i32
    scf.if %35 {
      %c0_38 = arith.constant 0 : index
      %c0_39 = arith.constant 0 : index
      %70 = vector.load %arg5[%c0_38, %c0_39] : memref<8x1xf32, #tpu.memory_space<vmem>>, vector<8x1xf32>
      %c0_40 = arith.constant 0 : index
      %c0_41 = arith.constant 0 : index
      %71 = vector.load %arg6[%c0_40, %c0_41] : memref<8x1xf32, #tpu.memory_space<vmem>>, vector<8x1xf32>
      %72 = math.log %71 : vector<8x1xf32>
      %73 = arith.addf %70, %72 : vector<8x1xf32>
      %c0_42 = arith.constant 0 : index
      %c0_43 = arith.constant 0 : index
      %74 = vector.load %arg9[%c0_42, %c0_43] : memref<1x1xf32, #tpu.memory_space<vmem>>, vector<1x1xf32>
      %75 = vector.shape_cast %73 : vector<8x1xf32> to vector<1x8x1xf32>
      %cst_44 = arith.constant dense<0.000000e+00> : vector<1xf32>
      %76 = vector.multi_reduction <add>, %75, %cst_44 [1, 2] : vector<1x8x1xf32> to vector<1xf32>
      %77 = vector.shape_cast %76 : vector<1xf32> to vector<1x1x1xf32>
      %78 = vector.extract %77[0, 0, 0] : f32 from vector<1x1x1xf32>
      %79 = vector.broadcast %78 : f32 to vector<1x1xf32>
      %80 = arith.addf %74, %79 : vector<1x1xf32>
      %c0_45 = arith.constant 0 : index
      %c0_46 = arith.constant 0 : index
      %81 = vector.load %arg9[%c0_45, %c0_46] : memref<1x1xf32, #tpu.memory_space<vmem>>, vector<1x1xf32>
      tpu.vector_store %arg9[%c0_45, %c0_46], %80 {strides = array<i32>} : memref<1x1xf32, #tpu.memory_space<vmem>>, vector<1x1xf32>,
    } else {
    }
    %36 = arith.index_cast %arg1 : i32 to index
    %c0_24 = arith.constant 0 : index
    %c0_25 = arith.constant 0 : index
    %37 = vector.load %arg7[%36, %c0_24, %c0_25] : memref<1x1x8xf32, #tpu.memory_space<vmem>>, vector<1x1x8xf32>
    %38 = vector.shape_cast %37 : vector<1x1x8xf32> to vector<1x8xf32>
    %39 = arith.index_cast %arg1 : i32 to index
    %c0_26 = arith.constant 0 : index
    %c0_27 = arith.constant 0 : index
    %40 = vector.load %arg8[%39, %c0_26, %c0_27] : memref<1x1x8xf32, #tpu.memory_space<vmem>>, vector<1x1x8xf32>
    %41 = vector.shape_cast %40 : vector<1x1x8xf32> to vector<1x8xf32>
    %cst_28 = arith.constant dense<0xFF800000> : vector<8xf32>
    %42 = vector.multi_reduction <maximumf>, %15, %cst_28 [0] : vector<8x8xf32> to vector<8xf32>
    %43 = vector.shape_cast %42 : vector<8xf32> to vector<1x8xf32>
    %44 = arith.maximumf %38, %43 : vector<1x8xf32>
    %45 = arith.subf %38, %44 : vector<1x8xf32>
    %46 = math.exp %45 : vector<1x8xf32>
    %47 = arith.mulf %41, %46 : vector<1x8xf32>
    %48 = vector.broadcast %44 : vector<1x8xf32> to vector<8x8xf32>
    %49 = arith.subf %15, %48 : vector<8x8xf32>
    %50 = math.exp %49 : vector<8x8xf32>
    %cst_29 = arith.constant dense<0.000000e+00> : vector<8xf32>
    %51 = vector.multi_reduction <add>, %50, %cst_29 [0] : vector<8x8xf32> to vector<8xf32>
    %52 = vector.shape_cast %51 : vector<8xf32> to vector<1x8xf32>
    %53 = arith.addf %47, %52 : vector<1x8xf32>
    %54 = arith.index_cast %arg1 : i32 to index
    %c0_30 = arith.constant 0 : index
    %c0_31 = arith.constant 0 : index
    %55 = vector.load %arg8[%54, %c0_30, %c0_31] : memref<1x1x8xf32, #tpu.memory_space<vmem>>, vector<1x1x8xf32>
    %56 = vector.shape_cast %55 : vector<1x1x8xf32> to vector<1x8xf32>
    %57 = vector.shape_cast %53 : vector<1x8xf32> to vector<1x1x8xf32>
    tpu.vector_store %arg8[%54, %c0_30, %c0_31], %57 {strides = array<i32>} : memref<1x1x8xf32, #tpu.memory_space<vmem>>, vector<1x1x8xf32>,
    %58 = arith.index_cast %arg1 : i32 to index
    %c0_32 = arith.constant 0 : index
    %c0_33 = arith.constant 0 : index
    %59 = vector.load %arg7[%58, %c0_32, %c0_33] : memref<1x1x8xf32, #tpu.memory_space<vmem>>, vector<1x1x8xf32>
    %60 = vector.shape_cast %59 : vector<1x1x8xf32> to vector<1x8xf32>
    %61 = vector.shape_cast %44 : vector<1x8xf32> to vector<1x1x8xf32>
    tpu.vector_store %arg7[%58, %c0_32, %c0_33], %61 {strides = array<i32>} : memref<1x1x8xf32, #tpu.memory_space<vmem>>, vector<1x1x8xf32>,
    %62 = arith.cmpi eq, %arg0, %arg1 : i32
    %63 = arith.extui %62 : i1 to i32
    %c0_i32_34 = arith.constant 0 : i32
    %64 = arith.cmpi ne, %63, %c0_i32_34 : i32
    scf.if %64 {
      %70 = tpu.iota {dimensions = array<i32: 0>} : vector<8x8xi32>
      %71 = tpu.iota {dimensions = array<i32: 1>} : vector<8x8xi32>
      %72 = arith.cmpi eq, %70, %71 : vector<8x8xi32>
      %c0_38 = arith.constant 0 : index
      %c0_39 = arith.constant 0 : index
      %73 = vector.load %arg10[%c0_38, %c0_39] : memref<1x1xf32, #tpu.memory_space<vmem>>, vector<1x1xf32>
      %cst_40 = arith.constant 0.000000e+00 : f32
      %74 = vector.broadcast %cst_40 : f32 to vector<8x8xf32>
      %75 = arith.select %72, %15, %74 : vector<8x8xi1>, vector<8x8xf32>
      %76 = vector.shape_cast %75 : vector<8x8xf32> to vector<1x8x8xf32>
      %cst_41 = arith.constant dense<0.000000e+00> : vector<1xf32>
      %77 = vector.multi_reduction <add>, %76, %cst_41 [1, 2] : vector<1x8x8xf32> to vector<1xf32>
      %78 = vector.shape_cast %77 : vector<1xf32> to vector<1x1x1xf32>
      %79 = vector.extract %78[0, 0, 0] : f32 from vector<1x1x1xf32>
      %80 = vector.broadcast %79 : f32 to vector<1x1xf32>
      %81 = arith.addf %73, %80 : vector<1x1xf32>
      %c0_42 = arith.constant 0 : index
      %c0_43 = arith.constant 0 : index
      %82 = vector.load %arg10[%c0_42, %c0_43] : memref<1x1xf32, #tpu.memory_space<vmem>>, vector<1x1xf32>
      tpu.vector_store %arg10[%c0_42, %c0_43], %81 {strides = array<i32>} : memref<1x1xf32, #tpu.memory_space<vmem>>, vector<1x1xf32>,
    } else {
    }
    %c0_i32_35 = arith.constant 0 : i32
    %65 = arith.cmpi eq, %arg0, %c0_i32_35 : i32
    %c0_i32_36 = arith.constant 0 : i32
    %66 = arith.cmpi eq, %arg1, %c0_i32_36 : i32
    %67 = arith.andi %65, %66 : i1
    %68 = arith.extui %67 : i1 to i32
    %c0_i32_37 = arith.constant 0 : i32
    %69 = arith.cmpi ne, %68, %c0_i32_37 : i32
    scf.if %69 {
      %c0_38 = arith.constant 0 : index
      %c0_39 = arith.constant 0 : index
      %c0_40 = arith.constant 0 : index
      %70 = vector.load %arg7[%c0_38, %c0_39, %c0_40] : memref<1x1x8xf32, #tpu.memory_space<vmem>>, vector<1x1x8xf32>
      %c0_41 = arith.constant 0 : index
      %c0_42 = arith.constant 0 : index
      %c0_43 = arith.constant 0 : index
      %71 = vector.load %arg8[%c0_41, %c0_42, %c0_43] : memref<1x1x8xf32, #tpu.memory_space<vmem>>, vector<1x1x8xf32>
      %cst_44 = arith.constant 9.99999991E-38 : f32
      %72 = vector.broadcast %cst_44 : f32 to vector<1x1x8xf32>
      %73 = arith.maximumf %71, %72 : vector<1x1x8xf32>
      %74 = math.log %73 : vector<1x1x8xf32>
      %75 = arith.addf %70, %74 : vector<1x1x8xf32>
      %76 = vector.shape_cast %75 : vector<1x1x8xf32> to vector<1x1x1x8xf32>
      %cst_45 = arith.constant dense<0.000000e+00> : vector<1xf32>
      %77 = vector.multi_reduction <add>, %76, %cst_45 [1, 2, 3] : vector<1x1x1x8xf32> to vector<1xf32>
      %78 = vector.shape_cast %77 : vector<1xf32> to vector<1x1x1x1xf32>
      %79 = vector.extract %78[0, 0, 0, 0] : f32 from vector<1x1x1x1xf32>
      %80 = vector.broadcast %79 : f32 to vector<1x1xf32>
      %c0_46 = arith.constant 0 : index
      %c0_47 = arith.constant 0 : index
      %81 = vector.load %arg9[%c0_46, %c0_47] : memref<1x1xf32, #tpu.memory_space<vmem>>, vector<1x1xf32>
      %82 = arith.addf %81, %80 : vector<1x1xf32>
      %cst_48 = arith.constant 6.250000e-02 : f32
      %83 = vector.broadcast %cst_48 : f32 to vector<1x1xf32>
      %84 = arith.mulf %82, %83 : vector<1x1xf32>
      %c0_49 = arith.constant 0 : index
      %c0_50 = arith.constant 0 : index
      %85 = vector.load %arg10[%c0_49, %c0_50] : memref<1x1xf32, #tpu.memory_space<vmem>>, vector<1x1xf32>
      %cst_51 = arith.constant 1.250000e-01 : f32
      %86 = vector.broadcast %cst_51 : f32 to vector<1x1xf32>
      %87 = arith.mulf %85, %86 : vector<1x1xf32>
      %88 = arith.subf %84, %87 : vector<1x1xf32>
      %c0_52 = arith.constant 0 : index
      %c0_53 = arith.constant 0 : index
      %89 = vector.load %arg4[%c0_52, %c0_53] : memref<1x1xf32, #tpu.memory_space<vmem>>, vector<1x1xf32>
      tpu.vector_store %arg4[%c0_52, %c0_53], %88 {strides = array<i32>} : memref<1x1xf32, #tpu.memory_space<vmem>>, vector<1x1xf32>,
    } else {
    }
    return
  }
  func.func @transform_0(%arg0: i32, %arg1: i32) -> (i32, i32) {
    %c0_i32 = arith.constant 0 : i32
    %c0_i32_0 = arith.constant 0 : i32
    return %arg0, %c0_i32 : i32, i32
  }
  func.func @transform_1(%arg0: i32, %arg1: i32) -> (i32, i32) {
    %c0_i32 = arith.constant 0 : i32
    %c0_i32_0 = arith.constant 0 : i32
    return %arg1, %c0_i32 : i32, i32
  }
  func.func @transform_2(%arg0: i32, %arg1: i32) -> (i32, i32) {
    %c0_i32 = arith.constant 0 : i32
    %c0_i32_0 = arith.constant 0 : i32
    %c0_i32_1 = arith.constant 0 : i32
    return %c0_i32, %c0_i32_0 : i32, i32
  }
}

</mosaic_0001>

<bundles_post_ra>
// kernel: tpu_custom_call.1
= control target key start
LH: loop header
LB: loop body
LE: loop exit
PB: predicated region body
PF: predicated region fallthrough
CT: control target
= control target key end

     0   :  { %7 = vsyncpa [#allocation9], 0  ;;  %s460_s0 = inlined_call_operand.hbm [shape: f32[8,32], index: 0, kind: input, shape index: {}]   ;;  %s461_s1 = inlined_call_operand.hbm [shape: f32[8,32], index: 1, kind: input, shape index: {}]   ;;  %s462_s2 = inlined_call_operand.hbm [shape: f32[1,1], index: 2, kind: output, shape index: {}]  }
   0x1   :  { %8 = vsyncpa [#allocation12], 0 }
   0x2   :  { %9 = vsyncpa [#allocation10], 0  ;;  %s388_s9 = smov [#allocation8]   ;;  %s389_s11 = smov [#allocation11]  }
   0x3   :  { %s16_s10 = sshll.u32 %s388_s9, 4  ;;  %s26_s12 = sshll.u32 %s389_s11, 4  ;;  %s17_s10 = int_to_ptr.vmem [resolvable:$true] %s16_s10  ;;  %s27_s12 = int_to_ptr.vmem [resolvable:$true] %s26_s12 }
   0x4   :  { %s330_s13 = scalar_lea.vmem %s17_s10, 128  ;;  %p335_p1 = scmp.lt.s32.totalorder %s17_s10, %s17_s10 }
   0x5   :  { %p331_p0 = scmp.ne.s32.totalorder %s17_s10, %s330_s13  ;;  %p336_p2 = scmp.lt.s32.totalorder %s330_s13, %s330_s13 }
   0x7   :  { %p337_p3 = por %p336_p2, %p335_p1 }
   0x9   :  { %p338_p4 = pnand %p337_p3, %p331_p0 }
   0xb   :  { %341 = shalt.err (!%p338_p4)
}
   0xc   :  { %19 = dma.hbm_to_vmem [thread:$0]  %s460_s0, 128, %s17_s10, [#allocation9]  }
   0xd   :  { %s350_s16 = scalar_lea.vmem %s27_s12, 128  ;;  %p355_p6 = scmp.lt.s32.totalorder %s27_s12, %s27_s12 }
   0xe   :  { %p351_p5 = scmp.ne.s32.totalorder %s27_s12, %s350_s16  ;;  %p356_p7 = scmp.lt.s32.totalorder %s350_s16, %s350_s16 }
  0x10   :  { %p357_p8 = por %p356_p7, %p355_p6 }
  0x12   :  { %p358_p9 = pnand %p357_p8, %p351_p5 }
  0x14   :  { %361 = shalt.err (!%p358_p9)
}
  0x15   :  { %29 = dma.hbm_to_vmem [thread:$0]  %s461_s1, 128, %s27_s12, [#allocation12]  }
  0x16   :  { %382 = dma.done.wait [#allocation9], 128  }
  0x17   :  { %383 = vsyncadd [#allocation9], 4294967168 }
  0x18   :  { %384 = dma.done.wait [#allocation12], 128  }
  0x19   :  { %385 = vsyncadd [#allocation12], 4294967168  ;;  %v390_v0 = vmov 0.0   ;;  %vm391_vm0 = vmmov 0   ;;  %vm60_vm1 = vcmask 261120   ;;  %v59_v1 = vld [vmem:[#allocation11] sm:$0xff]  ;;  %v200_v4 = vlaneseq }
  0x1a   :  { %291 = vmatprep.subr.mxu0 %v390_v0  ;;  %293 = vmatprep.mubr.msk.f32.mxu0 %vm391_vm0, %v390_v0  ;;  %v57_v2 = vld [vmem:[#allocation8] sm:$0xff]  ;;  %vm54_vm3 = vcmask 57344   ;;  %v392_v7 = vmov -1e+30   ;;  %vm48_vm4 = vcmask 7168   ;;  %vm137_vm5 = vcmask 64512  }
  0x1b   :  { %292 = vmatpush3.xpose.msk.msra.mxu0 %vm60_vm1, %v59_v1  ;;  %v58_v3 = vmul.f32 14.285714, %v57_v2  ;;  %v418_v5 = vshrl.u32 %v200_v4, 7  ;;  %v420_v6 = vand.u32 127, %v200_v4  ;;  %55 = vst.msk [vmem:[#allocation4] sm:$0x1] %vm54_vm3, %v392_v7 }
  0x1c   :  { %56 = vst.msk [vmem:[#allocation5] sm:$0x1] %vm54_vm3, %v390_v0  ;;  %v393_v19 = vmov 0   ;;  %vm42_vm6 = vcmask 0   ;;  %s394_s20 = smov [#allocation13]  }
  0x1d   :  { %vm227_vm2 = vcmp.eq.s32.totalorder %v418_v5, %v420_v6  ;;  %49 = vst.msk [vmem:[#allocation2] sm:$0xff] %vm48_vm4, %v392_v7  ;;  %50 = vst.msk [vmem:[#allocation3] sm:$0xff] %vm48_vm4, %v390_v0  ;;  %v202_v18 = vsub.s32 0, %v418_v5  ;;  %309 = vset.pattern.permute.xlu0 %v393_v19  ;;  %s277_s21 = sshll.u32 %s394_s20, 4  ;;  %s278_s21 = int_to_ptr.vmem [resolvable:$true] %s277_s21 }
  0x1e   :  { %294 = vmatmul.mubr.msk.f32.vlgmr.msra.gmra.mxu0 %vm60_vm1, %v58_v3  ;;  %43 = vst.msk [vmem:[#allocation6] sm:$0x1] %vm42_vm6, %v390_v0  ;;  %44 = vst.msk [vmem:[#allocation7] sm:$0x1] %vm42_vm6, %v390_v0  ;;  %s362_s22 = scalar_lea.vmem %s278_s21, 16  ;;  %s366_s23 = scalar_lea.vmem %s278_s21, 32 }
  0x1f   :  { %p363_p10 = scmp.ne.s32.totalorder %s278_s21, %s362_s22  ;;  %p367_p11 = scmp.lt.s32.totalorder %s278_s21, %s278_s21 }
  0x20   :  { %p368_p12 = scmp.lt.s32.totalorder %s366_s23, %s362_s22 }
  0x22   :  { %v186_v16 = vld [vmem:[#allocation4] sm:$0x1]  ;;  %p369_p13 = por %p368_p12, %p367_p11 }
  0x23   :  { %v187_v33 = vld [vmem:[#allocation5] sm:$0x1] }
  0x24   :  { %v141_v38 = vld [vmem:[#allocation2] sm:$0xff]  ;;  %v143_v49 = vld [vmem:[#allocation3] sm:$0xff]  ;;  %p370_p0 = pnand %p369_p13, %p363_p10 }
  0xde   :  { %v430_v8 = vpop.f32.mrf.mxu0 }
  0xdf   :  { %v138_v9 = vsel %vm137_vm5, %v430_v8, -inf  ;;  %v229_v63 = vsel %vm227_vm2, %v430_v8, 0.0 }
  0xe0   :  { %139 = vmax.xlane.f32.xlu0 %v138_v9  ;;  %v188_v10 = vrot.slane %v138_v9, 4  ;;  %v295_v11 = vpop.f32.mrf.mxu0  ;;  %v230_v2 = vsel %vm137_vm5, %v229_v63, 0.0 }
  0xe2   :  { %v189_v12 = vmax.f32 %v138_v9, %v188_v10 }
  0xe4   :  { %v190_v13 = vrot.slane %v189_v12, 2 }
  0xe6   :  { %v191_v14 = vmax.f32 %v189_v12, %v190_v13 }
  0xe8   :  { %v192_v15 = vrot.slane %v191_v14, 1 }
  0xea   :  { %v193_v17 = vmax.f32 %v191_v14, %v192_v15 }
  0xec   :  { %v194_v20 = vmax.f32 %v186_v16, %v193_v17 }
  0xee   :  { %v203_v21 = vrot.slane %v194_v20, %v202_v18  ;;  %218 = vst.msk [vmem:[#allocation4] sm:$0x1] %vm54_vm3, %v194_v20  ;;  %v195_v24 = vsub.f32 %v186_v16, %v194_v20 }
  0xf0   :  { %v205_v22 = vsub.f32 %v430_v8, %v203_v21  ;;  %v196_v25 = vmul.f32 1.442695, %v195_v24 }
  0xf2   :  { %v206_v23 = vmul.f32 1.442695, %v205_v22 }
  0xf4   :  { %310 = vpow2.f32 %v206_v23 }
  0xf5   :  { %312 = vpow2.f32 %v196_v25  ;;  %v246_v1 = vld [vmem:[#allocation4] sm:$0x1]  ;;  %v171_v25 = vld [vmem:[#allocation6] sm:$0x1] }
 0x101   :  { %v311_v26 = vpop.eup %310 }
 0x102   :  { %v208_v27 = vsel %vm137_vm5, %v311_v26, 0.0  ;;  %v313_v32 = vpop.eup %312 }
 0x103   :  { %v209_v28 = vrot.slane %v208_v27, 4  ;;  %v198_v35 = vmul.f32 %v313_v32, %v187_v33 }
 0x105   :  { %v210_v29 = vadd.f32 %v209_v28, %v208_v27  ;;  %v228_v28 = vld [vmem:[#allocation7] sm:$0x1] }
 0x107   :  { %v211_v30 = vrot.slane %v210_v29, 2 }
 0x109   :  { %v212_v31 = vadd.f32 %v211_v30, %v210_v29 }
 0x10b   :  { %v213_v34 = vrot.slane %v212_v31, 1 }
 0x10d   :  { %v214_v36 = vadd.f32 %v213_v34, %v212_v31 }
 0x10f   :  { %v215_v37 = vadd.f32 %v214_v36, %v198_v35 }
 0x111   :  { %217 = vst.msk [vmem:[#allocation5] sm:$0x1] %vm54_vm3, %v215_v37 }
 0x118   :  { %v247_v53 = vld [vmem:[#allocation5] sm:$0x1] }
 0x119   :  { %v248_v54 = vmax.f32 %v247_v53, 1e-37 }
 0x169   :  { %v140_v39 = vpop.xlane.xlu0 %139 }
 0x16a   :  { %v142_v40 = vmax.f32 %v141_v38, %v140_v39 }
 0x16c   :  { %v144_v41 = vsub.f32 %v141_v38, %v142_v40  ;;  %162 = vst.msk [vmem:[#allocation2] sm:$0xff] %vm48_vm4, %v142_v40  ;;  %150 = vperm.xlu0 %309, %v142_v40  }
 0x16e   :  { %v145_v47 = vmul.f32 1.442695, %v144_v41 }
 0x173   :  { %v166_v59 = vld [vmem:[#allocation2] sm:$0xff] }
 0x1e7   :  { %v151_v42 = vpop.permute.xlu0 %150 }
 0x1e8   :  { %v153_v43 = vsub.f32 %v430_v8, %v151_v42 }
 0x1ea   :  { %v154_v44 = vmul.f32 1.442695, %v153_v43 }
 0x1ec   :  { %314 = vpow2.f32 %v154_v44 }
 0x1ed   :  { %316 = vpow2.f32 %v145_v47 }
 0x1f9   :  { %v315_v45 = vpop.eup %314 }
 0x1fa   :  { %v156_v46 = vsel %vm137_vm5, %v315_v45, 0.0  ;;  %v317_v48 = vpop.eup %316 }
 0x1fb   :  { %157 = vadd.xlane.f32.xlu1 %v156_v46  ;;  %v147_v50 = vmul.f32 %v317_v48, %v143_v49 }
 0x284   :  { %v158_v51 = vpop.xlane.xlu1 %157 }
 0x285   :  { %v159_v52 = vadd.f32 %v158_v51, %v147_v50 }
 0x287   :  { %161 = vst.msk [vmem:[#allocation3] sm:$0xff] %vm48_vm4, %v159_v52 }
 0x28e   :  { %v167_v55 = vld [vmem:[#allocation3] sm:$0xff] }
 0x28f   :  { %318 = vlog2.f32 %v167_v55 }
 0x290   :  { %320 = vlog2.f32 %v248_v54 }
 0x29c   :  { %v319_v56 = vpop.eup %318 }
 0x29d   :  { %v169_v57 = vmul.f32 0.6931472, %v319_v56  ;;  %v321_v58 = vpop.eup %320 }
 0x29e   :  { %v250_v62 = vmul.f32 0.6931472, %v321_v58 }
 0x29f   :  { %v170_v60 = vadd.f32 %v169_v57, %v166_v59 }
 0x2a0   :  { %v251_v3 = vadd.f32 %v250_v62, %v246_v1 }
 0x2a1   :  { %v172_v61 = vsel %vm48_vm4, %v170_v60, 0.0 }
 0x2a2   :  { %173 = vadd.xlane.f32.xlu1 %v172_v61  ;;  %v252_v4 = vsel %vm54_vm3, %v251_v3, 0.0 }
 0x2a6   :  { %231 = vadd.xlane.f32.xlu1 %v230_v2 }
 0x2aa   :  { %253 = vadd.xlane.f32.xlu1 %v252_v4 }
 0x32b   :  { %v174_v7 = vpop.xlane.xlu1 %173 }
 0x32c   :  { %v175_v9 = vrot.slane %v174_v7, 4 }
 0x32e   :  { %v176_v10 = vadd.f32 %v175_v9, %v174_v7 }
 0x32f   :  { %v232_v5 = vpop.xlane.xlu1 %231 }
 0x330   :  { %v177_v6 = vrot.slane %v176_v10, 2  ;;  %v233_v8 = vrot.slane %v232_v5, 4 }
 0x332   :  { %v234_v11 = vadd.f32 %v233_v8, %v232_v5  ;;  %v178_v12 = vadd.f32 %v177_v6, %v176_v10 }
 0x333   :  { %v254_v13 = vpop.xlane.xlu1 %253 }
 0x334   :  { %v235_v14 = vrot.slane %v234_v11, 2  ;;  %v255_v15 = vrot.slane %v254_v13, 4  ;;  %v179_v16 = vrot.slane %v178_v12, 1 }
 0x336   :  { %v256_v17 = vadd.f32 %v255_v15, %v254_v13  ;;  %v180_v18 = vadd.f32 %v179_v16, %v178_v12  ;;  %v236_v19 = vadd.f32 %v235_v14, %v234_v11 }
 0x338   :  { %v257_v20 = vrot.slane %v256_v17, 2  ;;  %296 = vpush %v180_v18  ;;  %v237_v21 = vrot.slane %v236_v19, 1 }
 0x33a   :  { %v258_v22 = vadd.f32 %v257_v20, %v256_v17  ;;  %v238_v0 = vadd.f32 %v237_v21, %v236_v19 }
 0x33c   :  { %298 = vpush %v238_v0  ;;  %v259_v23 = vrot.slane %v258_v22, 1 }
 0x33e   :  { %v260_v24 = vadd.f32 %v259_v23, %v258_v22 }
 0x340   :  { %300 = vpush %v260_v24 }
 0x369   :  { %s297_s0 = spop %296 }
 0x36a   :  { %v182_v26 = vstv %s297_s0 }
 0x36b   :  { %v183_v27 = vadd.f32 %v182_v26, %v171_v25 }
 0x36d   :  { %185 = vst.msk [vmem:[#allocation6] sm:$0x1] %vm42_vm6, %v183_v27  ;;  %s299_s1 = spop %298 }
 0x36e   :  { %v240_v29 = vstv %s299_s1 }
 0x36f   :  { %v241_v30 = vadd.f32 %v240_v29, %v228_v28 }
 0x371   :  { %243 = vst.msk [vmem:[#allocation7] sm:$0x1] %vm42_vm6, %v241_v30  ;;  %s301_s19 = spop %300 }
 0x372   :  { %v262_v31 = vstv %s301_s19 }
 0x374   :  { %v263_v32 = vld [vmem:[#allocation6] sm:$0x1] }
 0x375   :  { %v264_v33 = vadd.f32 %v263_v32, %v262_v31 }
 0x377   :  { %v265_v35 = vmul.f32 0.0625, %v264_v33 }
 0x378   :  { %v266_v34 = vld [vmem:[#allocation7] sm:$0x1] }
 0x379   :  { %v267_v36 = vmul.f32 0.125, %v266_v34 }
 0x37b   :  { %v268_v37 = vsub.f32 %v265_v35, %v267_v36 }
 0x37d   :  { %270 = vst.msk [vmem:[#allocation13] sm:$0x1] %vm42_vm6, %v268_v37 }
 0x37e   :  { %373 = shalt.err (!%p370_p0)
}
 0x37f   :  { %280 = dma.vmem_to_hbm [thread:$0]  %s278_s21, 16, %s462_s2, [#allocation10]  }
 0x380   :  { %386 = dma.done.wait [#allocation10], 16  }
 0x381   :  { %387 = vsyncadd [#allocation10], 4294967280 }
 0x382   :  { %284 = vsyncpa [#allocation9], 1 }
 0x383   :  { %285 = vsyncpa [#allocation12], 1 }
 0x384   :  { %286 = vsyncpa [#allocation10], 1 }

</bundles_post_ra>
